<compile_context>
chip_gen: v7x
topology: tpu7x:2x2x1
jax: 0.10.0
libtpu: 0.0.40
codegen_flags: <defaults>
</compile_context>

<pallas_src>
import jax
import jax.numpy as jnp
from jax.experimental import pallas as pl
from jax.experimental.pallas import tpu as pltpu


def _round_up(a: int, b: int) -> int:
    return ((a + b - 1) // b) * b


def _choose_tile_n(N: int, H: int, block_n: int) -> int:
    """Pick the batch tile (lane) width.

    VMEM-per-step estimate (bytes): in+out blocks are (2, TN) f32, padded to 8
    sublanes and double-buffered -> 4 * 8 * TN * 4 = 128*TN, plus ~3 f32 (H, TN)
    temporaries (hT, sT, sT*dw) -> 12*H*TN.  Cap at ~10 MiB so the kernel fits
    every generation's scoped-VMEM default (v5e 16 MiB, v6e/v7x 32 MiB).
    """
    VMEM_BUDGET = 10 * 1024 * 1024
    per_col = 128 + 12 * H
    tn_cap = max(128, (VMEM_BUDGET // per_col) // 128 * 128)

    tn = min(_round_up(max(block_n, 128), 128),
             tn_cap,
             _round_up(max(N, 1), 128))

    # Keep >= 2 grid steps when the batch allows: lets ("parallel",) shard the
    # grid across both v7x TensorCores and gives the DMA pipeline overlap.
    if N > 2 * 128:
        tn = min(tn, _round_up(pl.cdiv(N, 2), 128))
    return max(tn, 128)


def network1_sig_kernel(xT_ref, w0T_ref, b0T_ref, dw_ref, db_ref, oT_ref):
    # xT_ref : (2, TN)   inputs, batch on the 128-lane axis
    # w0T_ref: (H, 2)    first-layer weights, transposed
    # b0T_ref: (H, 1)    first-layer bias (column)
    # dw_ref : (H, 1)    w1[:, 0] - w1[:, 1]
    # db_ref : (1, 1)    b1[0] - b1[1]
    # oT_ref : (2, TN)   rows = [p0; p1]
    xT = xT_ref[...]                       # (2, TN)
    w0T = w0T_ref[...]                     # (H, 2)

    # ---- Linear 0 as VPU broadcast-FMA (K=2; MXU would be <2% utilized) ----
    # hT[j, n] = w0[0, j] * x[n, 0] + (w0[1, j] * x[n, 1] + b0[j])
    # (A stride-0 sublane-broadcast load of the x rows would shave a few % of
    #  broadcast traffic; kept as plain broadcasting for lowering robustness.)
    hT = w0T[:, 0:1] * xT[0:1, :] + (w0T[:, 1:2] * xT[1:2, :] + b0T_ref[...])

    # ---- Sigmoid via tanh identity: sigmoid(z) = 0.5*tanh(z/2) + 0.5 ----
    # One EUP op per element; no exp + full-precision divide chain.
    # (bf16 hidden-layer variant would give ~2x EUP on v6e/v7x but breaks the
    #  1e-5 f32 tolerance, so it is not enabled here.)
    sT = 0.5 * jnp.tanh(0.5 * hT) + 0.5    # (H, TN)

    # ---- Fused Linear 1 + 2-class softmax ----
    # d = (s @ w1[:,0] + b1[0]) - (s @ w1[:,1] + b1[1]);  p0 = sigmoid(d)
    d = jnp.sum(sT * dw_ref[...], axis=0, keepdims=True) + db_ref[...]   # (1, TN)
    p0 = 0.5 * jnp.tanh(0.5 * d) + 0.5     # (1, TN)

    # Single 2-sublane store (v5e has one vector-store slot per bundle).
    oT_ref[...] = jnp.concatenate([p0, 1.0 - p0], axis=0).astype(oT_ref.dtype)


def network1_sig_forward_fm(xT, w0, b0, w1, b1, *, block_n: int = 16384):
    """Feature-major entry point.

    xT: (2, N) float32 (batch on the trailing axis).  Returns probabilities
    as (2, N) float32.  No wrapper-side transpose/relayout passes.
    """
    f_in, N = xT.shape
    H = w0.shape[1]
    assert f_in == 2 and w0.shape == (2, H) and w1.shape == (H, 2)

    xT = jnp.asarray(xT, jnp.float32)
    w0T = jnp.asarray(w0, jnp.float32).T                                  # (H, 2)
    b0T = jnp.asarray(b0, jnp.float32).reshape(H, 1)                      # (H, 1)
    w1f = jnp.asarray(w1, jnp.float32)
    b1f = jnp.asarray(b1, jnp.float32).reshape(-1)
    dw = (w1f[:, 0] - w1f[:, 1]).reshape(H, 1)                            # (H, 1)
    db = (b1f[0] - b1f[1]).reshape(1, 1)                                  # (1, 1)

    TN = _choose_tile_n(N, H, block_n)
    N_pad = _round_up(N, TN)
    if N_pad != N:
        xT = jnp.pad(xT, ((0, 0), (0, N_pad - N)))
    grid = (N_pad // TN,)

    cost = pl.CostEstimate(
        flops=int(N_pad * (7 * H + 6)),
        transcendentals=int(N_pad * (H + 1)),
        bytes_accessed=int(4 * (4 * N_pad + 4 * H + 1)),
    )

    oT = pl.pallas_call(
        network1_sig_kernel,
        out_shape=jax.ShapeDtypeStruct((2, N_pad), jnp.float32),
        grid=grid,
        in_specs=[
            pl.BlockSpec((2, TN), lambda i: (0, i)),    # xT, tiled over batch
            pl.BlockSpec((H, 2), lambda i: (0, 0)),     # w0T (VMEM-resident)
            pl.BlockSpec((H, 1), lambda i: (0, 0)),     # b0T
            pl.BlockSpec((H, 1), lambda i: (0, 0)),     # dw = w1[:,0]-w1[:,1]
            pl.BlockSpec((1, 1), lambda i: (0, 0)),     # db = b1[0]-b1[1]
        ],
        out_specs=pl.BlockSpec((2, TN), lambda i: (0, i)),
        compiler_params=pltpu.CompilerParams(
            dimension_semantics=("parallel",),          # independent batch tiles
            vmem_limit_bytes=32 * 1024 * 1024,
        ),
        cost_estimate=cost,
    )(xT, w0T, b0T, dw, db)

    return oT[:, :N]


def network1_sig_forward(x, w0, b0, w1, b1, *, block_n: int = 16384):
    """PyTorch-contract wrapper: x (N, 2) -> probabilities (N, 2).

    The x.T / .T here are separate XLA relayout passes (extra HBM traffic);
    prefer network1_sig_forward_fm inside a larger graph.
    """
    xT = jnp.asarray(x, jnp.float32).T                                    # (2, N)
    return network1_sig_forward_fm(xT, w0, b0, w1, b1, block_n=block_n).T


def reference_forward(x, w0, b0, w1, b1):
    hp = jax.lax.Precision.HIGHEST
    h = jax.nn.sigmoid(jnp.dot(x, w0, precision=hp) + b0)
    logits = jnp.dot(h, w1, precision=hp) + b1
    return jax.nn.softmax(logits, axis=-1)


if __name__ == "__main__":
    key = jax.random.PRNGKey(0)
    k_x, k_w0, k_b0, k_w1, k_b1 = jax.random.split(key, 5)

    batch = 512          # with the >=2-step rule this runs as 2 pipelined grid steps of TN=256
    in_features = 2
    hidden = 32
    out_features = 2

    # Deterministic synthetic parameters (PyTorch LinearLayer-style uniform init).
    x = jax.random.normal(k_x, (batch, in_features), dtype=jnp.float32)
    lim0 = 1.0 / jnp.sqrt(in_features)
    w0 = jax.random.uniform(k_w0, (in_features, hidden), minval=-lim0, maxval=lim0, dtype=jnp.float32)
    b0 = jax.random.uniform(k_b0, (1, hidden), minval=-lim0, maxval=lim0, dtype=jnp.float32)
    lim1 = 1.0 / jnp.sqrt(hidden)
    w1 = jax.random.uniform(k_w1, (hidden, out_features), minval=-lim1, maxval=lim1, dtype=jnp.float32)
    b1 = jax.random.uniform(k_b1, (1, out_features), minval=-lim1, maxval=lim1, dtype=jnp.float32)

    out = network1_sig_forward(x, w0, b0, w1, b1)
    out = jax.block_until_ready(out)

    ref = reference_forward(x, w0, b0, w1, b1)
    assert out.shape == (batch, out_features)
    assert jnp.allclose(out, ref, atol=1e-5, rtol=1e-5), "Pallas output mismatch vs reference"
    # Softmax rows sum to 1.
    assert jnp.allclose(jnp.sum(out, axis=-1), 1.0, atol=1e-5)

    print("KERNEL_OK")
</pallas_src>

<mosaic_0001>
module attributes {stable_mosaic.version = 11 : i64} {
  func.func @network1_sig_kernel(%arg0: i32, %arg1: memref<2x256xf32, #tpu.memory_space<vmem>>, %arg2: memref<32x2xf32, #tpu.memory_space<vmem>>, %arg3: memref<32x1xf32, #tpu.memory_space<vmem>>, %arg4: memref<32x1xf32, #tpu.memory_space<vmem>>, %arg5: memref<1x1xf32, #tpu.memory_space<vmem>>, %arg6: memref<2x256xf32, #tpu.memory_space<vmem>>) attributes {dimension_semantics = [#tpu.dimension_semantics<parallel>], iteration_bounds = array<i64: 2>, scalar_prefetch = 0 : i64, scratch_operands = 0 : i64, tpu.core_type = #tpu.core_type<tc>, window_params = [{transform_indices = @transform_0, window_bounds = array<i64: 2, 256>}, {pipeline_mode = #tpu.pipeline_mode<synchronous>, transform_indices = @transform_1, window_bounds = array<i64: 32, 2>}, {pipeline_mode = #tpu.pipeline_mode<synchronous>, transform_indices = @transform_2, window_bounds = array<i64: 32, 1>}, {pipeline_mode = #tpu.pipeline_mode<synchronous>, transform_indices = @transform_3, window_bounds = array<i64: 32, 1>}, {pipeline_mode = #tpu.pipeline_mode<synchronous>, transform_indices = @transform_4, window_bounds = array<i64: 1, 1>}, {transform_indices = @transform_5, window_bounds = array<i64: 2, 256>}]} {
    %c0 = arith.constant 0 : index
    %c0_0 = arith.constant 0 : index
    %0 = vector.load %arg1[%c0, %c0_0] : memref<2x256xf32, #tpu.memory_space<vmem>>, vector<2x256xf32>
    %c0_1 = arith.constant 0 : index
    %c0_2 = arith.constant 0 : index
    %1 = vector.load %arg2[%c0_1, %c0_2] : memref<32x2xf32, #tpu.memory_space<vmem>>, vector<32x2xf32>
    %2 = vector.extract_strided_slice %1 {offsets = [0, 0], sizes = [32, 1], strides = [1, 1]} : vector<32x2xf32> to vector<32x1xf32>
    %3 = vector.extract_strided_slice %0 {offsets = [0, 0], sizes = [1, 256], strides = [1, 1]} : vector<2x256xf32> to vector<1x256xf32>
    %4 = vector.broadcast %2 : vector<32x1xf32> to vector<32x256xf32>
    %5 = vector.broadcast %3 : vector<1x256xf32> to vector<32x256xf32>
    %6 = arith.mulf %4, %5 : vector<32x256xf32>
    %7 = vector.extract_strided_slice %1 {offsets = [0, 1], sizes = [32, 1], strides = [1, 1]} : vector<32x2xf32> to vector<32x1xf32>
    %8 = vector.extract_strided_slice %0 {offsets = [1, 0], sizes = [1, 256], strides = [1, 1]} : vector<2x256xf32> to vector<1x256xf32>
    %9 = vector.broadcast %7 : vector<32x1xf32> to vector<32x256xf32>
    %10 = vector.broadcast %8 : vector<1x256xf32> to vector<32x256xf32>
    %11 = arith.mulf %9, %10 : vector<32x256xf32>
    %c0_3 = arith.constant 0 : index
    %c0_4 = arith.constant 0 : index
    %12 = vector.load %arg3[%c0_3, %c0_4] : memref<32x1xf32, #tpu.memory_space<vmem>>, vector<32x1xf32>
    %13 = vector.broadcast %12 : vector<32x1xf32> to vector<32x256xf32>
    %14 = arith.addf %11, %13 : vector<32x256xf32>
    %15 = arith.addf %6, %14 : vector<32x256xf32>
    %cst = arith.constant 5.000000e-01 : f32
    %16 = vector.broadcast %cst : f32 to vector<32x256xf32>
    %17 = arith.mulf %16, %15 : vector<32x256xf32>
    %18 = math.tanh %17 : vector<32x256xf32>
    %cst_5 = arith.constant 5.000000e-01 : f32
    %19 = vector.broadcast %cst_5 : f32 to vector<32x256xf32>
    %20 = arith.mulf %19, %18 : vector<32x256xf32>
    %cst_6 = arith.constant 5.000000e-01 : f32
    %21 = vector.broadcast %cst_6 : f32 to vector<32x256xf32>
    %22 = arith.addf %20, %21 : vector<32x256xf32>
    %c0_7 = arith.constant 0 : index
    %c0_8 = arith.constant 0 : index
    %23 = vector.load %arg4[%c0_7, %c0_8] : memref<32x1xf32, #tpu.memory_space<vmem>>, vector<32x1xf32>
    %24 = vector.broadcast %23 : vector<32x1xf32> to vector<32x256xf32>
    %25 = arith.mulf %22, %24 : vector<32x256xf32>
    %cst_9 = arith.constant dense<0.000000e+00> : vector<256xf32>
    %26 = vector.multi_reduction <add>, %25, %cst_9 [0] : vector<32x256xf32> to vector<256xf32>
    %27 = vector.shape_cast %26 : vector<256xf32> to vector<1x256xf32>
    %c0_10 = arith.constant 0 : index
    %c0_11 = arith.constant 0 : index
    %28 = vector.load %arg5[%c0_10, %c0_11] : memref<1x1xf32, #tpu.memory_space<vmem>>, vector<1x1xf32>
    %29 = vector.broadcast %28 : vector<1x1xf32> to vector<1x256xf32>
    %30 = arith.addf %27, %29 : vector<1x256xf32>
    %cst_12 = arith.constant 5.000000e-01 : f32
    %31 = vector.broadcast %cst_12 : f32 to vector<1x256xf32>
    %32 = arith.mulf %31, %30 : vector<1x256xf32>
    %33 = math.tanh %32 : vector<1x256xf32>
    %cst_13 = arith.constant 5.000000e-01 : f32
    %34 = vector.broadcast %cst_13 : f32 to vector<1x256xf32>
    %35 = arith.mulf %34, %33 : vector<1x256xf32>
    %cst_14 = arith.constant 5.000000e-01 : f32
    %36 = vector.broadcast %cst_14 : f32 to vector<1x256xf32>
    %37 = arith.addf %35, %36 : vector<1x256xf32>
    %cst_15 = arith.constant 1.000000e+00 : f32
    %38 = vector.broadcast %cst_15 : f32 to vector<1x256xf32>
    %39 = arith.subf %38, %37 : vector<1x256xf32>
    %40 = tpu.concatenate %37, %39 in 0 : vector<1x256xf32>, vector<1x256xf32> -> vector<2x256xf32>
    %c0_16 = arith.constant 0 : index
    %c0_17 = arith.constant 0 : index
    %41 = vector.load %arg6[%c0_16, %c0_17] : memref<2x256xf32, #tpu.memory_space<vmem>>, vector<2x256xf32>
    tpu.vector_store %arg6[%c0_16, %c0_17], %40 {strides = array<i32>} : memref<2x256xf32, #tpu.memory_space<vmem>>, vector<2x256xf32>,
    return
  }
  func.func @transform_0(%arg0: i32) -> (i32, i32) {
    %c0_i32 = arith.constant 0 : i32
    %c0_i32_0 = arith.constant 0 : i32
    return %c0_i32, %arg0 : i32, i32
  }
  func.func @transform_1(%arg0: i32) -> (i32, i32) {
    %c0_i32 = arith.constant 0 : i32
    %c0_i32_0 = arith.constant 0 : i32
    %c0_i32_1 = arith.constant 0 : i32
    return %c0_i32, %c0_i32_0 : i32, i32
  }
  func.func @transform_2(%arg0: i32) -> (i32, i32) {
    %c0_i32 = arith.constant 0 : i32
    %c0_i32_0 = arith.constant 0 : i32
    %c0_i32_1 = arith.constant 0 : i32
    return %c0_i32, %c0_i32_0 : i32, i32
  }
  func.func @transform_3(%arg0: i32) -> (i32, i32) {
    %c0_i32 = arith.constant 0 : i32
    %c0_i32_0 = arith.constant 0 : i32
    %c0_i32_1 = arith.constant 0 : i32
    return %c0_i32, %c0_i32_0 : i32, i32
  }
  func.func @transform_4(%arg0: i32) -> (i32, i32) {
    %c0_i32 = arith.constant 0 : i32
    %c0_i32_0 = arith.constant 0 : i32
    %c0_i32_1 = arith.constant 0 : i32
    return %c0_i32, %c0_i32_0 : i32, i32
  }
  func.func @transform_5(%arg0: i32) -> (i32, i32) {
    %c0_i32 = arith.constant 0 : i32
    %c0_i32_0 = arith.constant 0 : i32
    return %c0_i32, %arg0 : i32, i32
  }
}

</mosaic_0001>

<bundles_post_ra>
// kernel: tpu_custom_call.1
= control target key start
LH: loop header
LB: loop body
LE: loop exit
PB: predicated region body
PF: predicated region fallthrough
CT: control target
= control target key end

     0   :  { %s876_s0 = inlined_call_operand.vmem [shape: f32[2,512], index: 0, kind: input, shape index: {}]   ;;  %s877_s1 = inlined_call_operand.vmem [shape: f32[32,2], index: 1, kind: input, shape index: {}]   ;;  %s878_s2 = inlined_call_operand.vmem [shape: f32[32,1], index: 2, kind: input, shape index: {}]   ;;  %s879_s3 = inlined_call_operand.vmem [shape: f32[32,1], index: 3, kind: input, shape index: {}]   ;;  %s880_s4 = inlined_call_operand.<no memory space> [shape: f32[1,1], index: 4, kind: input, shape index: {}]   ;;  %s881_s5 = inlined_call_operand.hbm [shape: f32[2,512], index: 5, kind: output, shape index: {}]  }
   0x1   :  { %v10_v0 = vstv %s880_s4 }
   0x2   :  { %11 = vst [vmem:[#allocation2] sm:$0x1] %v10_v0 }
   0x3   :  { %12 = vsyncpa [#allocation4], 0 }
   0x4   :  { %14 = vsyncpa [#allocation4 + $0x1], 0  ;;  %s735_s20 = smov 0   ;;  %s737_s21 = smov 0  }
   0x5   :  { %s739_s22 = smov 0   ;;  %s741_s23 = smov 0  }
   0x6 LB: > { %s756_s4 = sadd.s32 4294967295, %s697_s23   ;;  %s555_s24 = sadd.s32 4294967294, %s697_s23   ;;  %s697_s23 = sphi %s741_s23, %s887_s23   ;;  %s693_s22 = sphi %s739_s22, %s886_s22   ;;  %s689_s21 = sphi %s737_s21, %s885_s21   ;;  %s685_s20 = sphi %s735_s20, %s884_s20  }
   0x7   : > { %s760_s25 = sadd.s32 1, %s697_s23   ;;  %s137_s26 = sadd.s32 1, %s693_s22 }
   0x8   : > { %s134_s27 = ssub.s32 %s697_s23, %s760_s25  ;;  %p147_p0 = scmp.ne.s32.totalorder %s693_s22, %s689_s21 }
   0x9   : > { %p135_p1 = scmp.eq.s32.totalorder %s134_s27, 0  ;;  %p148_p2 = scmp.eq.s32.totalorder %s756_s4, 1 }
   0xa   : > { %p153_p3 = scmp.ne.s32.totalorder %s689_s21, %s685_s20  ;;  %p154_p4 = scmp.eq.s32.totalorder %s555_s24, 1 }
   0xb   : > { %s771_s28 = scalar_select %p135_p1, %s693_s22, %s137_s26  }
   0xc   : > { %p773_p5 = por %p148_p2, %p147_p0  ;;  %p777_p6 = por %p154_p4, %p153_p3 }
   0xd   : > { %p558_p7 = scmp.ge.s32.totalorder %s697_s23, 1  ;;  %p193_p8 = scmp.lt.s32.totalorder %s697_s23, 3 }
   0xf   : > { %p194_p9 = pnand %p558_p7, %p193_p8 }
  0x10   : > { %v229_v1 = vld [vmem:[%s877_s1] sm:$0xff] (!%p194_p9)  ;;  %v699_v2 = vmov (!%p194_p9), 1   ;;  %v700_v3 = vmov (!%p194_p9), 0   ;;  %v230_v4 = vld [vmem:[%s877_s1 + $0x8] sm:$0xff] (!%p194_p9)  ;;  %v231_v6 = vld [vmem:[%s877_s1 + $0x10] sm:$0xff] (!%p194_p9)  ;;  %s560_s13 = sshll.u32 (!%p194_p9), %s756_s4, 1  ;;  %v254_v16 = vlaneseq (!%p194_p9) }
  0x11   : > { %197 = sbr.rel (%p194_p9) target bundleno = 244 (0xf4), region = 40  ;;  %610 = vset.pattern.permute.xlu0 (!%p194_p9), %v699_v2  ;;  %611 = vset.pattern.permute.xlu1 (!%p194_p9), %v700_v3  ;;  %v322_v5 = vld [vmem:[%s878_s2] sm:$0xff] (!%p194_p9)  ;;  %v323_v7 = vld [vmem:[%s878_s2 + $0x8] sm:$0xff] (!%p194_p9)  ;;  %v232_v8 = vld [vmem:[%s877_s1 + $0x18] sm:$0xff] (!%p194_p9)  ;;  %p222_p10 = scmp.lt.s32.totalorder (!%p194_p9), %s560_s13, 3  ;;  %vm466_vm0 = vcmask (!%p194_p9), 1040384  }
  0x12   : > { %235 = vperm.xlu1 (!%p194_p9), %611, %v229_v1   ;;  %281 = vperm.xlu0 (!%p194_p9), %610, %v229_v1   ;;  %v324_v9 = vld [vmem:[%s878_s2 + $0x10] sm:$0xff] (!%p194_p9)  ;;  %v325_v10 = vld [vmem:[%s878_s2 + $0x18] sm:$0xff] (!%p194_p9)  ;;  %v395_v11 = vld [vmem:[%s879_s3 + $0x8] sm:$0xff] (!%p194_p9)  ;;  %v255_v17 = vshrl.u32 (!%p194_p9), %v254_v16, 7  ;;  %s218_s18 = sand.u32 (!%p194_p9), 1, %s689_s21   ;;  %s568_s24 = sshll.u32 (!%p194_p9), %s756_s4, 6 }
  0x13   : > { %v394_v12 = vld [vmem:[%s879_s3] sm:$0xff] (!%p194_p9)  ;;  %v397_v13 = vld [vmem:[%s879_s3 + $0x18] sm:$0xff] (!%p194_p9)  ;;  %v396_v14 = vld [vmem:[%s879_s3 + $0x10] sm:$0xff] (!%p194_p9)  ;;  %s559_s19 = sshll.u32 (!%p194_p9), %s218_s18, 2  ;;  %s834_s8 = scalar_lea.hbm (!%p194_p9), %s881_s5, %s568_s24 }
  0x14   : > { %v444_v15 = vld [vmem:[#allocation2] sm:$0x1] (!%p194_p9)  ;;  %v298_v18 = vsub.s32 (!%p194_p9), 1, %v255_v17  ;;  %v302_v19 = vsub.s32 (!%p194_p9), 3, %v255_v17  ;;  %v823_v21 = vsub.s32 (!%p194_p9), 0, %v255_v17  ;;  %v260_v22 = vsub.s32 (!%p194_p9), 2, %v255_v17 }
  0x15   : > { %s220_s26 = scalar_lea.vmem (!%p194_p9), [#allocation3], %s559_s19  ;;  %s482_s9 = scalar_lea.sflag (!%p194_p9), [#allocation4], %s218_s18 }
  0x16   : > { %240 = vperm.xlu1 (!%p194_p9), %611, %v230_v4   ;;  %285 = vperm.xlu0 (!%p194_p9), %610, %v230_v4   ;;  %s496_s27 = sshll.u32 (!%p194_p9), %s220_s26, 4  ;;  %s701_s4 = smov (!%p194_p9), [#allocation3]   ;;  %s836_s27 = int_to_ptr.vmem [resolvable:$true] %s496_s27 }
  0x17   : > { %s635_s10 = scalar_lea.vmem (!%p194_p9), %s836_s27, 64  ;;  %s639_s11 = sshll.u32 (!%p194_p9), %s701_s4, 4  ;;  %s640_s11 = int_to_ptr.vmem [resolvable:$false] %s639_s11 }
  0x18   : > { %s889_s13 = smov (!%p222_p10, %s560_s13), 3  ;;  %p636_p11 = scmp.ne.s32.totalorder %s836_s27, %s635_s10 }
  0x19   : > { %s561_s14 = sshll.u32 %s889_s13, 1  ;;  %s641_s12 = scalar_lea.vmem %s640_s11, 128 }
  0x1a   : > { %328 = vperm.xlu1 %611, %v322_v5   ;;  %289 = vperm.xlu0 %610, %v231_v6   ;;  %s225_s17 = scalar_lea.vmem %s876_s0, %s561_s14  ;;  %p637_p12 = pnand %p636_p11, %p773_p5 }
  0x1b   : > { %v228_v20 = vld [vmem:[%s225_s17] sm:$0xf]  ;;  %p642_p0 = scmp.lt.s32.totalorder %s836_s27, %s640_s11  ;;  %p643_p1 = scmp.lt.s32.totalorder %s641_s12, %s635_s10 }
  0x1c   : > { %v299_v23 = vrot.slane %v228_v20, %v298_v18  ;;  %v303_v24 = vrot.slane %v228_v20, %v302_v19  ;;  %v257_v27 = vrot.slane %v228_v20, %v823_v21  ;;  %v261_v28 = vrot.slane %v228_v20, %v260_v22  ;;  %p638_p13 = pneg %p637_p12 }
  0x1d   : > { %p644_p2 = por %p643_p1, %p642_p0 }
  0x1e   : > { %245 = vperm.xlu1 %611, %v231_v6   ;;  %612 = vset.pattern.permute.xlu0 %v700_v3  ;;  %v309_v29 = vrot.slane %v299_v23, %v298_v18  ;;  %v313_v30 = vrot.slane %v303_v24, %v298_v18  ;;  %v267_v33 = vrot.slane %v257_v27, %v823_v21 }
  0x1f   : > { %333 = vperm.xlu0 %612, %v323_v7   ;;  %v271_v34 = vrot.slane %v261_v28, %v823_v21  ;;  %p645_p3 = pnand %p644_p2, %p638_p13 }
  0x22   : > { %613 = vset.pattern.permute.xlu1 %v699_v2 }
  0x23   : > { %293 = vperm.xlu1 %613, %v232_v8   ;;  %338 = vperm.xlu0 %612, %v324_v9  }
  0x27   : > { %614 = vset.pattern.permute.xlu1 %v700_v3  ;;  %343 = vperm.xlu0 %612, %v325_v10  }
  0x28   : > { %250 = vperm.xlu1 %614, %v232_v8  }
  0x2b   : > { %405 = vperm.xlu0 %612, %v395_v11  }
  0x2c   : > { %400 = vperm.xlu1 %614, %v394_v12  }
  0x2f   : > { %415 = vperm.xlu0 %612, %v397_v13  }
  0x30   : > { %410 = vperm.xlu1 %614, %v396_v14  }
  0x34   : > { %447 = vperm.xlu1 %614, %v444_v15  }
  0x91   : > { %v236_v25 = vpop.permute.xlu1 %235  ;;  %v282_v26 = vpop.permute.xlu0 %281 }
  0x92   : > { %v314_v35 = vmul.f32 %v309_v29, %v282_v26  ;;  %v315_v36 = vmul.f32 %v313_v30, %v282_v26  ;;  %v272_v39 = vmul.f32 %v267_v33, %v236_v25  ;;  %v273_v40 = vmul.f32 %v271_v34, %v236_v25 }
  0x95   : > { %v241_v31 = vpop.permute.xlu1 %240  ;;  %v286_v32 = vpop.permute.xlu0 %285 }
  0x96   : > { %v316_v45 = vmul.f32 %v309_v29, %v286_v32  ;;  %v317_v46 = vmul.f32 %v313_v30, %v286_v32  ;;  %v274_v48 = vmul.f32 %v267_v33, %v241_v31  ;;  %v275_v50 = vmul.f32 %v271_v34, %v241_v31 }
  0x99   : > { %v329_v37 = vpop.permute.xlu1 %328  ;;  %v290_v38 = vpop.permute.xlu0 %289 }
  0x9a   : > { %v346_v41 = vadd.f32 %v329_v37, %v314_v35  ;;  %v347_v42 = vadd.f32 %v329_v37, %v315_v36  ;;  %v318_v57 = vmul.f32 %v309_v29, %v290_v38  ;;  %v319_v58 = vmul.f32 %v313_v30, %v290_v38 }
  0x9c   : > { %v354_v43 = vadd.f32 %v346_v41, %v272_v39  ;;  %v355_v44 = vadd.f32 %v347_v42, %v273_v40 }
  0x9d   : > { %v246_v47 = vpop.permute.xlu1 %245 }
  0x9e   : > { %v334_v49 = vpop.permute.xlu0 %333  ;;  %v362_v51 = vmul.f32 0.5, %v354_v43  ;;  %v363_v54 = vmul.f32 0.5, %v355_v44  ;;  %v276_v61 = vmul.f32 %v267_v33, %v246_v47  ;;  %v277_v0 = vmul.f32 %v271_v34, %v246_v47 }
  0x9f   : > { %v348_v52 = vadd.f32 %v334_v49, %v316_v45  ;;  %v349_v53 = vadd.f32 %v334_v49, %v317_v46 }
  0xa0   : > { %615 = vtanh.f32 %v362_v51 }
  0xa1   : > { %v356_v55 = vadd.f32 %v348_v52, %v274_v48  ;;  %v357_v56 = vadd.f32 %v349_v53, %v275_v50  ;;  %617 = vtanh.f32 %v363_v54 }
  0xa2   : > { %v294_v59 = vpop.permute.xlu1 %293  ;;  %v339_v60 = vpop.permute.xlu0 %338 }
  0xa3   : > { %v364_v62 = vmul.f32 0.5, %v356_v55  ;;  %v365_v63 = vmul.f32 0.5, %v357_v56  ;;  %v350_v1 = vadd.f32 %v339_v60, %v318_v57  ;;  %v351_v2 = vadd.f32 %v339_v60, %v319_v58 }
  0xa4   : > { %v320_v3 = vmul.f32 %v309_v29, %v294_v59  ;;  %v321_v4 = vmul.f32 %v313_v30, %v294_v59 }
  0xa5   : > { %619 = vtanh.f32 %v364_v62  ;;  %v358_v5 = vadd.f32 %v350_v1, %v276_v61  ;;  %v359_v6 = vadd.f32 %v351_v2, %v277_v0 }
  0xa6   : > { %621 = vtanh.f32 %v365_v63  ;;  %v344_v7 = vpop.permute.xlu0 %343 }
  0xa7   : > { %v352_v8 = vadd.f32 %v344_v7, %v320_v3  ;;  %v353_v9 = vadd.f32 %v344_v7, %v321_v4  ;;  %v251_v10 = vpop.permute.xlu1 %250  ;;  %v366_v11 = vmul.f32 0.5, %v358_v5  ;;  %v367_v12 = vmul.f32 0.5, %v359_v6 }
  0xa8   : > { %v278_v13 = vmul.f32 %v267_v33, %v251_v10  ;;  %v279_v14 = vmul.f32 %v271_v34, %v251_v10 }
  0xa9   : > { %623 = vtanh.f32 %v366_v11 }
  0xaa   : > { %v360_v15 = vadd.f32 %v352_v8, %v278_v13  ;;  %v361_v16 = vadd.f32 %v353_v9, %v279_v14  ;;  %625 = vtanh.f32 %v367_v12  ;;  %v616_v19 = vpop.eup %615  ;;  %v406_v35 = vpop.permute.xlu0 %405 }
  0xab   : > { %v618_v20 = vpop.eup %617  ;;  %v378_v26 = vmul.f32 0.5, %v616_v19  ;;  %v401_v27 = vpop.permute.xlu1 %400 }
  0xac   : > { %v368_v17 = vmul.f32 0.5, %v360_v15  ;;  %v369_v18 = vmul.f32 0.5, %v361_v16  ;;  %v379_v28 = vmul.f32 0.5, %v618_v20 }
  0xad   : > { %v386_v33 = vadd.f32 0.5, %v378_v26 }
  0xae   : > { %627 = vtanh.f32 %v368_v17  ;;  %v387_v36 = vadd.f32 0.5, %v379_v28  ;;  %v416_v54 = vpop.permute.xlu0 %415 }
  0xaf   : > { %v620_v22 = vpop.eup %619  ;;  %629 = vtanh.f32 %v369_v18  ;;  %v411_v42 = vpop.permute.xlu1 %410  ;;  %v418_v45 = vmul.f32 %v401_v27, %v386_v33 }
  0xb0   : > { %v622_v23 = vpop.eup %621  ;;  %v380_v24 = vmul.f32 0.5, %v620_v22  ;;  %v419_v48 = vmul.f32 %v401_v27, %v387_v36 }
  0xb1   : > { %v381_v25 = vmul.f32 0.5, %v622_v23 }
  0xb2   : > { %v388_v29 = vadd.f32 0.5, %v380_v24 }
  0xb3   : > { %v624_v30 = vpop.eup %623  ;;  %v389_v31 = vadd.f32 0.5, %v381_v25  ;;  %v448_v5 = vpop.permute.xlu1 %447 }
  0xb4   : > { %v626_v32 = vpop.eup %625  ;;  %v382_v34 = vmul.f32 0.5, %v624_v30  ;;  %v420_v38 = vmul.f32 %v406_v35, %v388_v29  ;;  %v453_v10 = vrot.slane %v448_v5, %v823_v21 }
  0xb5   : > { %v383_v37 = vmul.f32 0.5, %v626_v32  ;;  %v421_v41 = vmul.f32 %v406_v35, %v389_v31 }
  0xb6   : > { %v390_v39 = vadd.f32 0.5, %v382_v34  ;;  %v426_v51 = vadd.f32 %v420_v38, %v418_v45 }
  0xb7   : > { %v391_v43 = vadd.f32 0.5, %v383_v37  ;;  %v435_v53 = vadd.f32 %v421_v41, %v419_v48 }
  0xb8   : > { %v628_v40 = vpop.eup %627  ;;  %v422_v47 = vmul.f32 %v411_v42, %v390_v39 }
  0xb9   : > { %v630_v44 = vpop.eup %629  ;;  %v384_v46 = vmul.f32 0.5, %v628_v40  ;;  %v423_v50 = vmul.f32 %v411_v42, %v391_v43 }
  0xba   : > { %v385_v49 = vmul.f32 0.5, %v630_v44  ;;  %v427_v57 = vadd.f32 %v426_v51, %v422_v47 }
  0xbb   : > { %v392_v52 = vadd.f32 0.5, %v384_v46  ;;  %v436_v59 = vadd.f32 %v435_v53, %v423_v50 }
  0xbc   : > { %v393_v55 = vadd.f32 0.5, %v385_v49 }
  0xbd   : > { %v424_v56 = vmul.f32 %v416_v54, %v392_v52 }
  0xbe   : > { %v425_v58 = vmul.f32 %v416_v54, %v393_v55 }
  0xbf   : > { %v428_v60 = vadd.f32 %v427_v57, %v424_v56 }
  0xc0   : > { %v437_v61 = vadd.f32 %v436_v59, %v425_v58 }
  0xc1   : > { %v429_v62 = vrot.slane %v428_v60, 4 }
  0xc2   : > { %v438_v63 = vrot.slane %v437_v61, 4 }
  0xc3   : > { %v430_v0 = vadd.f32 %v429_v62, %v428_v60 }
  0xc4   : > { %v439_v1 = vadd.f32 %v438_v63, %v437_v61 }
  0xc5   : > { %v431_v2 = vrot.slane %v430_v0, 2 }
  0xc6   : > { %v440_v3 = vrot.slane %v439_v1, 2 }
  0xc7   : > { %v432_v4 = vadd.f32 %v431_v2, %v430_v0 }
  0xc8   : > { %v441_v6 = vadd.f32 %v440_v3, %v439_v1 }
  0xc9   : > { %v433_v7 = vrot.slane %v432_v4, 1 }
  0xca   : > { %v442_v8 = vrot.slane %v441_v6, 1 }
  0xcb   : > { %v434_v9 = vadd.f32 %v433_v7, %v432_v4 }
  0xcc   : > { %v443_v11 = vadd.f32 %v442_v8, %v441_v6 }
  0xcd   : > { %v454_v12 = vadd.f32 %v453_v10, %v434_v9 }
  0xce   : > { %v455_v13 = vadd.f32 %v453_v10, %v443_v11 }
  0xcf   : > { %v456_v14 = vmul.f32 0.5, %v454_v12 }
  0xd0   : > { %v457_v15 = vmul.f32 0.5, %v455_v13 }
  0xd1   : > { %631 = vtanh.f32 %v456_v14 }
  0xd2   : > { %633 = vtanh.f32 %v457_v15 }
  0xdb   : > { %v632_v16 = vpop.eup %631 }
  0xdc   : > { %v634_v17 = vpop.eup %633  ;;  %v460_v18 = vmul.f32 0.5, %v632_v16 }
  0xdd   : > { %v461_v19 = vmul.f32 0.5, %v634_v17 }
  0xde   : > { %v462_v20 = vadd.f32 0.5, %v460_v18 }
  0xdf   : > { %v463_v22 = vadd.f32 0.5, %v461_v19 }
  0xe0   : > { %v464_v23 = vsub.f32 1.0, %v462_v20 }
  0xe1   : > { %v465_v21 = vsub.f32 1.0, %v463_v22 }
  0xe2   : > { %v467_v24 = vsel %vm466_vm0, %v462_v20, %v464_v23 }
  0xe3   : > { %v468_v25 = vsel %vm466_vm0, %v463_v22, %v465_v21 }
  0xe4   : > { %v471_v26 = vcombine.low %v467_v24, %v468_v25 }
  0xe6   : > { %562 = vst.sshfl [vmem:[%s220_s26] sm:$0x33 pattern:$0x76325410] %v471_v26 }
  0xe7   : > { %648 = shalt.err (!%p645_p3)
}
  0xe8   : > { %s649_s13 = scalar_lea.hbm %s834_s8, 64  ;;  %s653_s16 = scalar_lea.hbm %s881_s5, 128 }
  0xe9   : > { %p650_p4 = scmp.ne.s32.totalorder %s834_s8, %s649_s13  ;;  %p654_p9 = scmp.lt.u32.totalorder %s834_s8, %s881_s5 }
  0xea   : > { %p655_p10 = scmp.lt.u32.totalorder %s653_s16, %s649_s13  ;;  %p657_p12 = scmp.lt.u32.totalorder %s649_s13, %s834_s8 }
  0xeb   : > { %p651_p7 = pnand %p650_p4, %p773_p5 }
  0xec   : > { %p656_p11 = por %p655_p10, %p654_p9 }
  0xed   : > { %p652_p8 = pneg %p651_p7 }
  0xee   : > { %p658_p13 = por %p657_p12, %p656_p11 }
  0xf0   : > { %p659_p0 = pnand %p658_p13, %p652_p8 }
  0xf2   : > { %662 = shalt.err (!%p659_p0)
}
  0xf3   : > { %569 = dma.vmem_to_hbm [thread:$0]  (%p773_p5), %s836_s27, 64, %s834_s8, %s482_s9  }
  0xf4 PF: > { %p575_p1 = scmp.ge.s32.totalorder %s697_s23, 2  ;;  %s508_s19 = sand.u32 1, %s685_s20  }
  0xf5   : > { %s509_s24 = scalar_lea.sflag [#allocation4], %s508_s19 }
  0xf6   : > { %p572_p2 = pnand %p575_p1, %p777_p6 }
  0xf8   : > { %680 = dma.done.wait (!%p572_p2), %s509_s24, 64  }
  0xf9   : > { %682 = vsyncadd (!%p572_p2), %s509_s24, 4294967232  ;;  %p17_p3 = scmp.ge.s32.totalorder %s760_s25, 4   ;;  %s884_s20 = smov %s689_s21 }
  0xfa   : > { %s885_s21 = smov %s693_s22  ;;  %s886_s22 = smov %s771_s28 }
  0xfb   : > { %s887_s23 = smov %s760_s25  ;;  %19 = sbr.rel (!%p17_p3) target bundleno = 6 (0x6), region = 75 }
 0x102   :  { %514 = vsyncpa [#allocation4], 1 }
 0x103   :  { %516 = vsyncpa [#allocation4 + $0x1], 1 }

</bundles_post_ra>
